<compile_context>
chip_gen: v7x
topology: tpu7x:2x2x1
jax: 0.10.0
libtpu: 0.0.40
codegen_flags: <defaults>
</compile_context>

<pallas_src>
import functools

import jax
import jax.numpy as jnp
from jax import lax
from jax.experimental import pallas as pl
from jax.experimental.pallas import tpu as pltpu


def _infonce_kernel(*refs, masked, row_sum_on_mxu):
    """One (row-tile i, col-tile j) step: MXU sim tile + online logsumexp.

    refs (masked=True):  nvalid(SMEM), e1(T,D), e2(T,D), rows(T,1), m, l, diag
    refs (masked=False): e1(T,D), e2(T,D), rows(T,1), m, l, diag
    """
    if masked:
        nvalid_ref, e1_ref, e2_ref, rows_ref, m_sc, l_sc, diag_sc = refs
    else:
        e1_ref, e2_ref, rows_ref, m_sc, l_sc, diag_sc = refs

    i = pl.program_id(0)
    j = pl.program_id(1)

    @pl.when(j == 0)
    def _init():
        m_sc[...] = jnp.full(m_sc.shape, -jnp.inf, dtype=m_sc.dtype)
        l_sc[...] = jnp.zeros(l_sc.shape, dtype=l_sc.dtype)

    # MXU matmul contracting D of both operands (A @ B.T layout, no explicit
    # transpose of the e2 tile). Operands are already normalized and scaled
    # by 1/temp in the wrapper; accumulation is f32.
    sim = lax.dot_general(
        e1_ref[...], e2_ref[...],
        dimension_numbers=(((1,), (1,)), ((), ())),
        preferred_element_type=jnp.float32)

    if masked:
        n_valid = nvalid_ref[0]
        col = j * sim.shape[1] + lax.broadcasted_iota(jnp.int32, sim.shape, 1)
        sim = jnp.where(col < n_valid, sim, -1e30)

    # Diagonal (label) logits sim[r, r] live in the i == j tile: take them
    # from the same sim values that enter the softmax (bf16-consistent).
    @pl.when(i == j)
    def _diag():
        r = lax.broadcasted_iota(jnp.int32, sim.shape, 0)
        c = lax.broadcasted_iota(jnp.int32, sim.shape, 1)
        diag_sc[...] = jnp.sum(jnp.where(r == c, sim, 0.0),
                               axis=1, keepdims=True)

    # Online (streaming) logsumexp over the column tiles.
    m_prev = m_sc[...]
    m_new = jnp.maximum(m_prev, jnp.max(sim, axis=1, keepdims=True))
    p = jnp.exp(sim - m_new)
    if row_sum_on_mxu:
        # Flash-attention-style row sum on the MXU (frees the XLU at large T).
        ones = jnp.ones((p.shape[1], 1), dtype=jnp.bfloat16)
        row_sum = lax.dot_general(
            p.astype(jnp.bfloat16), ones,
            dimension_numbers=(((1,), (0,)), ((), ())),
            preferred_element_type=jnp.float32)
    else:
        row_sum = jnp.sum(p, axis=1, keepdims=True)
    l_sc[...] = jnp.exp(m_prev - m_new) * l_sc[...] + row_sum
    m_sc[...] = m_new

    # Finalize: per-row CE loss_r = logsumexp(sim[r, :]) - sim[r, r].
    @pl.when(j == pl.num_programs(1) - 1)
    def _finalize():
        rows_ref[...] = m_sc[...] + jnp.log(l_sc[...]) - diag_sc[...]


def _tile_footprint_bytes(t, d, in_itemsize):
    inputs = 2 * 2 * t * d * in_itemsize   # e1/e2 tiles, double-buffered
    interm = 3 * t * t * 4                 # (T,T) f32 sim / exp / mask values
    scratch = 8 * t * 4                    # m / l / diag / out column vectors
    return inputs + interm + scratch


def _pick_block(b, d, in_itemsize, vmem_bytes):
    """Largest convenient tile (multiple of 8/128) under the VMEM budget."""
    if b <= 8:
        return b                           # single full-extent block is legal
    budget = int(vmem_bytes * 0.6)         # headroom for Mosaic internals
    for t in (1024, 512, 256, 128, 64, 32, 16, 8):
        if t >= b:
            continue                       # keep >= 2 row tiles (v7x: 2 TCs)
        if _tile_footprint_bytes(t, d, in_itemsize) <= budget:
            return t
    return 8


def _vmem_limit_bytes(t, d, in_itemsize, vmem_bytes):
    fp = _tile_footprint_bytes(t, d, in_itemsize)
    return int(min(0.9 * vmem_bytes, max(32 * 1024 * 1024, 2 * fp)))


def dynamic_infonce_loss(embeddings1, embeddings2, current_temp, *,
                         block_size=None, mxu_bf16=True, row_sum_on_mxu=False):
    """Pallas implementation of DynamicInfoNCELoss.forward (mean CE, labels=arange(B))."""
    B, D = embeddings1.shape
    assert embeddings2.shape == (B, D)

    # ---- hoisted preprocessing (one fused XLA pass over (B, D)) ------------
    eps = 1e-12
    e1 = embeddings1.astype(jnp.float32)
    e2 = embeddings2.astype(jnp.float32)
    # F.normalize(p=2, dim=1): x * rsqrt(max(sum(x^2), eps^2))
    e1n = e1 * lax.rsqrt(jnp.maximum(jnp.sum(e1 * e1, axis=1, keepdims=True), eps * eps))
    e2n = e2 * lax.rsqrt(jnp.maximum(jnp.sum(e2 * e2, axis=1, keepdims=True), eps * eps))
    inv_temp = 1.0 / jnp.asarray(current_temp, dtype=jnp.float32)
    in_dtype = jnp.bfloat16 if mxu_bf16 else jnp.float32
    lhs = (e1n * inv_temp).astype(in_dtype)   # fold 1/temp into embeddings1
    rhs = e2n.astype(in_dtype)

    # ---- generation- and D-aware tiling -------------------------------------
    in_itemsize = jnp.dtype(in_dtype).itemsize
    try:
        vmem_bytes = int(pltpu.get_tpu_info().vmem_capacity_bytes)
    except Exception:
        vmem_bytes = 64 * 1024 * 1024         # conservative (v7x per-TC VMEM)
    t = _pick_block(B, D, in_itemsize, vmem_bytes) if block_size is None else block_size
    assert t == B or t % 8 == 0, (B, t)

    nb = -(-B // t)
    b_pad = nb * t
    masked = b_pad != B
    if masked:
        # Pad to a tile multiple; padded columns are masked in-kernel and
        # padded rows are dropped from the mean below.
        pad = b_pad - B
        lhs = jnp.pad(lhs, ((0, pad), (0, 0)))
        rhs = jnp.pad(rhs, ((0, pad), (0, 0)))

    kernel = functools.partial(_infonce_kernel, masked=masked,
                               row_sum_on_mxu=row_sum_on_mxu)

    in_specs = [
        pl.BlockSpec((t, D), lambda i, j: (i, 0)),   # embeddings1 row tile
        pl.BlockSpec((t, D), lambda i, j: (j, 0)),   # embeddings2 col tile
    ]
    args = [lhs, rhs]
    if masked:
        in_specs = [pl.BlockSpec(memory_space=pltpu.SMEM)] + in_specs
        args = [jnp.asarray([B], dtype=jnp.int32)] + args

    rows = pl.pallas_call(
        kernel,
        out_shape=jax.ShapeDtypeStruct((b_pad, 1), jnp.float32),
        grid=(nb, nb),
        in_specs=in_specs,
        out_specs=pl.BlockSpec((t, 1), lambda i, j: (i, 0)),
        scratch_shapes=[
            pltpu.VMEM((t, 1), jnp.float32),   # m   (running max)
            pltpu.VMEM((t, 1), jnp.float32),   # l   (running sum of exp)
            pltpu.VMEM((t, 1), jnp.float32),   # diagonal (label) logits
        ],
        compiler_params=pltpu.CompilerParams(
            dimension_semantics=("parallel", "arbitrary"),
            vmem_limit_bytes=_vmem_limit_bytes(t, D, in_itemsize, vmem_bytes),
        ),
    )(*args)

    # Mean over the B valid per-row losses (F.cross_entropy "mean" reduction).
    return jnp.mean(rows[:B])


def _reference_loss(e1, e2, temp):
    # Pure-JAX reference for validation.
    e1n = e1 / jnp.maximum(jnp.linalg.norm(e1, axis=1, keepdims=True), 1e-12)
    e2n = e2 / jnp.maximum(jnp.linalg.norm(e2, axis=1, keepdims=True), 1e-12)
    sim = (e1n @ e2n.T) / temp
    logp = sim - jax.scipy.special.logsumexp(sim, axis=1, keepdims=True)
    return -jnp.mean(jnp.diag(logp))


if __name__ == "__main__":
    # DynamicInfoNCELoss(initial_temp=1, final_temp=0.07, total_batches=10000):
    # at construction, current_temp == initial_temp == 1.0.
    # TODO(synk): update_temperature / calculate_decay_rate are host-side
    # Python state (no kernel work); pass the scheduled temp in per call.
    current_temp = 1.0

    key = jax.random.PRNGKey(0)
    k1, k2, k3, k4, k5, k6 = jax.random.split(key, 6)

    # Small case (single tile, shapes consistent with the module's toy usage).
    B, D = 8, 32
    e1 = jax.random.normal(k1, (B, D), dtype=jnp.float32)
    e2 = jax.random.normal(k2, (B, D), dtype=jnp.float32)
    ref = _reference_loss(e1, e2, current_temp)
    loss = jax.block_until_ready(dynamic_infonce_loss(e1, e2, current_temp))
    assert jnp.allclose(loss, ref, atol=2e-2, rtol=2e-2), (loss, ref)
    loss_f32 = jax.block_until_ready(
        dynamic_infonce_loss(e1, e2, current_temp, mxu_bf16=False))
    assert jnp.allclose(loss_f32, ref, atol=1e-5, rtol=1e-5), (loss_f32, ref)

    # Medium case: exercises the tiled (parallel rows) x (arbitrary cols) grid.
    B2, D2 = 512, 128
    e1b = jax.random.normal(k3, (B2, D2), dtype=jnp.float32)
    e2b = jax.random.normal(k4, (B2, D2), dtype=jnp.float32)
    ref2 = _reference_loss(e1b, e2b, current_temp)
    loss2 = jax.block_until_ready(dynamic_infonce_loss(e1b, e2b, current_temp))
    assert jnp.allclose(loss2, ref2, atol=2e-2, rtol=2e-2), (loss2, ref2)
    loss2b = jax.block_until_ready(
        dynamic_infonce_loss(e1b, e2b, current_temp, row_sum_on_mxu=True))
    assert jnp.allclose(loss2b, ref2, atol=2e-2, rtol=2e-2), (loss2b, ref2)

    # Ragged case: B not a tile multiple -> padded + column-masked path.
    B3, D3 = 20, 32
    e1c = jax.random.normal(k5, (B3, D3), dtype=jnp.float32)
    e2c = jax.random.normal(k6, (B3, D3), dtype=jnp.float32)
    ref3 = _reference_loss(e1c, e2c, current_temp)
    loss3 = jax.block_until_ready(dynamic_infonce_loss(e1c, e2c, current_temp))
    assert jnp.allclose(loss3, ref3, atol=2e-2, rtol=2e-2), (loss3, ref3)

    print("KERNEL_OK")
</pallas_src>

<mosaic_0001>
module attributes {stable_mosaic.version = 11 : i64} {
  func.func @_infonce_kernel(%arg0: i32, %arg1: i32, %arg2: memref<8x32xbf16, #tpu.memory_space<vmem>>, %arg3: memref<8x32xbf16, #tpu.memory_space<vmem>>, %arg4: memref<8x1xf32, #tpu.memory_space<vmem>>, %arg5: memref<8x1xf32, #tpu.memory_space<vmem>>, %arg6: memref<8x1xf32, #tpu.memory_space<vmem>>, %arg7: memref<8x1xf32, #tpu.memory_space<vmem>>) attributes {dimension_semantics = [#tpu.dimension_semantics<parallel>, #tpu.dimension_semantics<arbitrary>], iteration_bounds = array<i64: 1, 1>, scalar_prefetch = 0 : i64, scratch_operands = 3 : i64, tpu.core_type = #tpu.core_type<tc>, window_params = [{transform_indices = @transform_0, window_bounds = array<i64: 8, 32>}, {transform_indices = @transform_1, window_bounds = array<i64: 8, 32>}, {transform_indices = @transform_2, window_bounds = array<i64: 8, 1>}]} {
    %c0_i32 = arith.constant 0 : i32
    %0 = arith.cmpi eq, %arg1, %c0_i32 : i32
    %1 = arith.extui %0 : i1 to i32
    %c0_i32_0 = arith.constant 0 : i32
    %2 = arith.cmpi ne, %1, %c0_i32_0 : i32
    scf.if %2 {
      %cst_17 = arith.constant 0xFF800000 : f32
      %28 = vector.broadcast %cst_17 : f32 to vector<8x1xf32>
      %c0_18 = arith.constant 0 : index
      %c0_19 = arith.constant 0 : index
      %29 = vector.load %arg5[%c0_18, %c0_19] : memref<8x1xf32, #tpu.memory_space<vmem>>, vector<8x1xf32>
      tpu.vector_store %arg5[%c0_18, %c0_19], %28 {strides = array<i32>} : memref<8x1xf32, #tpu.memory_space<vmem>>, vector<8x1xf32>,
      %cst_20 = arith.constant 0.000000e+00 : f32
      %30 = vector.broadcast %cst_20 : f32 to vector<8x1xf32>
      %c0_21 = arith.constant 0 : index
      %c0_22 = arith.constant 0 : index
      %31 = vector.load %arg6[%c0_21, %c0_22] : memref<8x1xf32, #tpu.memory_space<vmem>>, vector<8x1xf32>
      tpu.vector_store %arg6[%c0_21, %c0_22], %30 {strides = array<i32>} : memref<8x1xf32, #tpu.memory_space<vmem>>, vector<8x1xf32>,
    } else {
    }
    %c0 = arith.constant 0 : index
    %c0_1 = arith.constant 0 : index
    %3 = vector.load %arg2[%c0, %c0_1] : memref<8x32xbf16, #tpu.memory_space<vmem>>, vector<8x32xbf16>
    %c0_2 = arith.constant 0 : index
    %c0_3 = arith.constant 0 : index
    %4 = vector.load %arg3[%c0_2, %c0_3] : memref<8x32xbf16, #tpu.memory_space<vmem>>, vector<8x32xbf16>
    %cst = arith.constant dense<0.000000e+00> : vector<8x8xf32>
    %5 = tpu.matmul %3, %4, %cst {dimension_numbers = #tpu.dot_dimension_numbers<[1], [1], [0], [0], [0, 0, 1, 0], [], []>} : vector<8x32xbf16>, vector<8x32xbf16>, vector<8x8xf32> -> vector<8x8xf32>
    %6 = arith.cmpi eq, %arg0, %arg1 : i32
    %7 = arith.extui %6 : i1 to i32
    %c0_i32_4 = arith.constant 0 : i32
    %8 = arith.cmpi ne, %7, %c0_i32_4 : i32
    scf.if %8 {
      %28 = tpu.iota {dimensions = array<i32: 0>} : vector<8x8xi32>
      %29 = tpu.iota {dimensions = array<i32: 1>} : vector<8x8xi32>
      %30 = arith.cmpi eq, %28, %29 : vector<8x8xi32>
      %cst_17 = arith.constant 0.000000e+00 : f32
      %31 = vector.broadcast %cst_17 : f32 to vector<8x8xf32>
      %32 = arith.select %30, %5, %31 : vector<8x8xi1>, vector<8x8xf32>
      %cst_18 = arith.constant dense<0.000000e+00> : vector<8xf32>
      %33 = vector.multi_reduction <add>, %32, %cst_18 [1] : vector<8x8xf32> to vector<8xf32>
      %34 = vector.shape_cast %33 : vector<8xf32> to vector<8x1xf32>
      %c0_19 = arith.constant 0 : index
      %c0_20 = arith.constant 0 : index
      %35 = vector.load %arg7[%c0_19, %c0_20] : memref<8x1xf32, #tpu.memory_space<vmem>>, vector<8x1xf32>
      tpu.vector_store %arg7[%c0_19, %c0_20], %34 {strides = array<i32>} : memref<8x1xf32, #tpu.memory_space<vmem>>, vector<8x1xf32>,
    } else {
    }
    %c0_5 = arith.constant 0 : index
    %c0_6 = arith.constant 0 : index
    %9 = vector.load %arg5[%c0_5, %c0_6] : memref<8x1xf32, #tpu.memory_space<vmem>>, vector<8x1xf32>
    %cst_7 = arith.constant dense<0xFF800000> : vector<8xf32>
    %10 = vector.multi_reduction <maximumf>, %5, %cst_7 [1] : vector<8x8xf32> to vector<8xf32>
    %11 = vector.shape_cast %10 : vector<8xf32> to vector<8x1xf32>
    %12 = arith.maximumf %9, %11 : vector<8x1xf32>
    %13 = vector.broadcast %12 : vector<8x1xf32> to vector<8x8xf32>
    %14 = arith.subf %5, %13 : vector<8x8xf32>
    %15 = math.exp %14 : vector<8x8xf32>
    %cst_8 = arith.constant dense<0.000000e+00> : vector<8xf32>
    %16 = vector.multi_reduction <add>, %15, %cst_8 [1] : vector<8x8xf32> to vector<8xf32>
    %17 = vector.shape_cast %16 : vector<8xf32> to vector<8x1xf32>
    %18 = arith.subf %9, %12 : vector<8x1xf32>
    %19 = math.exp %18 : vector<8x1xf32>
    %c0_9 = arith.constant 0 : index
    %c0_10 = arith.constant 0 : index
    %20 = vector.load %arg6[%c0_9, %c0_10] : memref<8x1xf32, #tpu.memory_space<vmem>>, vector<8x1xf32>
    %21 = arith.mulf %19, %20 : vector<8x1xf32>
    %22 = arith.addf %21, %17 : vector<8x1xf32>
    %c0_11 = arith.constant 0 : index
    %c0_12 = arith.constant 0 : index
    %23 = vector.load %arg6[%c0_11, %c0_12] : memref<8x1xf32, #tpu.memory_space<vmem>>, vector<8x1xf32>
    tpu.vector_store %arg6[%c0_11, %c0_12], %22 {strides = array<i32>} : memref<8x1xf32, #tpu.memory_space<vmem>>, vector<8x1xf32>,
    %c0_13 = arith.constant 0 : index
    %c0_14 = arith.constant 0 : index
    %24 = vector.load %arg5[%c0_13, %c0_14] : memref<8x1xf32, #tpu.memory_space<vmem>>, vector<8x1xf32>
    tpu.vector_store %arg5[%c0_13, %c0_14], %12 {strides = array<i32>} : memref<8x1xf32, #tpu.memory_space<vmem>>, vector<8x1xf32>,
    %c0_i32_15 = arith.constant 0 : i32
    %25 = arith.cmpi eq, %arg1, %c0_i32_15 : i32
    %26 = arith.extui %25 : i1 to i32
    %c0_i32_16 = arith.constant 0 : i32
    %27 = arith.cmpi ne, %26, %c0_i32_16 : i32
    scf.if %27 {
      %c0_17 = arith.constant 0 : index
      %c0_18 = arith.constant 0 : index
      %28 = vector.load %arg5[%c0_17, %c0_18] : memref<8x1xf32, #tpu.memory_space<vmem>>, vector<8x1xf32>
      %c0_19 = arith.constant 0 : index
      %c0_20 = arith.constant 0 : index
      %29 = vector.load %arg6[%c0_19, %c0_20] : memref<8x1xf32, #tpu.memory_space<vmem>>, vector<8x1xf32>
      %30 = math.log %29 : vector<8x1xf32>
      %31 = arith.addf %28, %30 : vector<8x1xf32>
      %c0_21 = arith.constant 0 : index
      %c0_22 = arith.constant 0 : index
      %32 = vector.load %arg7[%c0_21, %c0_22] : memref<8x1xf32, #tpu.memory_space<vmem>>, vector<8x1xf32>
      %33 = arith.subf %31, %32 : vector<8x1xf32>
      %c0_23 = arith.constant 0 : index
      %c0_24 = arith.constant 0 : index
      %34 = vector.load %arg4[%c0_23, %c0_24] : memref<8x1xf32, #tpu.memory_space<vmem>>, vector<8x1xf32>
      tpu.vector_store %arg4[%c0_23, %c0_24], %33 {strides = array<i32>} : memref<8x1xf32, #tpu.memory_space<vmem>>, vector<8x1xf32>,
    } else {
    }
    return
  }
  func.func @transform_0(%arg0: i32, %arg1: i32) -> (i32, i32) {
    %c0_i32 = arith.constant 0 : i32
    %c0_i32_0 = arith.constant 0 : i32
    return %arg0, %c0_i32 : i32, i32
  }
  func.func @transform_1(%arg0: i32, %arg1: i32) -> (i32, i32) {
    %c0_i32 = arith.constant 0 : i32
    %c0_i32_0 = arith.constant 0 : i32
    return %arg1, %c0_i32 : i32, i32
  }
  func.func @transform_2(%arg0: i32, %arg1: i32) -> (i32, i32) {
    %c0_i32 = arith.constant 0 : i32
    %c0_i32_0 = arith.constant 0 : i32
    return %arg0, %c0_i32 : i32, i32
  }
}

</mosaic_0001>

<bundles_post_ra>
// kernel: tpu_custom_call.1
= control target key start
LH: loop header
LB: loop body
LE: loop exit
PB: predicated region body
PF: predicated region fallthrough
CT: control target
= control target key end

     0   :  { %7 = vsyncpa [#allocation6], 0  ;;  %s278_s0 = inlined_call_operand.hbm [shape: bf16[8,32], index: 0, kind: input, shape index: {}]   ;;  %s279_s1 = inlined_call_operand.hbm [shape: bf16[8,32], index: 1, kind: input, shape index: {}]   ;;  %s280_s2 = inlined_call_operand.vmem [shape: f32[8,1], index: 2, kind: output, shape index: {}]  }
   0x1   :  { %8 = vsyncpa [#allocation8], 0  ;;  %s221_s9 = smov [#allocation5]   ;;  %s222_s11 = smov [#allocation7]  }
   0x2   :  { %s15_s10 = sshll.u32 %s221_s9, 4  ;;  %s25_s12 = sshll.u32 %s222_s11, 4  ;;  %s16_s10 = int_to_ptr.vmem [resolvable:$true] %s15_s10  ;;  %s26_s12 = int_to_ptr.vmem [resolvable:$true] %s25_s12 }
   0x3   :  { %s173_s15 = scalar_lea.hbm %s278_s0, 64 }
   0x4   :  { %p174_p0 = scmp.ne.s32.totalorder %s278_s0, %s173_s15  ;;  %p177_p1 = scmp.lt.u32.totalorder %s173_s15, %s278_s0 }
   0x6   :  { %p179_p2 = pnand %p177_p1, %p174_p0 }
   0x8   :  { %182 = shalt.err (!%p179_p2)
}
   0x9   :  { %s183_s20 = scalar_lea.vmem %s16_s10, 64  ;;  %p188_p4 = scmp.lt.s32.totalorder %s16_s10, %s16_s10 }
   0xa   :  { %p184_p3 = scmp.ne.s32.totalorder %s16_s10, %s183_s20  ;;  %p189_p5 = scmp.lt.s32.totalorder %s183_s20, %s183_s20 }
   0xc   :  { %p190_p6 = por %p189_p5, %p188_p4 }
   0xe   :  { %p191_p7 = pnand %p190_p6, %p184_p3 }
  0x10   :  { %194 = shalt.err (!%p191_p7)
}
  0x11   :  { %18 = dma.hbm_to_vmem [thread:$0]  %s278_s0, 64, %s16_s10, [#allocation6]  }
  0x12   :  { %s195_s25 = scalar_lea.hbm %s279_s1, 64 }
  0x13   :  { %p196_p8 = scmp.ne.s32.totalorder %s279_s1, %s195_s25  ;;  %p199_p9 = scmp.lt.u32.totalorder %s195_s25, %s279_s1 }
  0x15   :  { %p201_p10 = pnand %p199_p9, %p196_p8 }
  0x17   :  { %204 = shalt.err (!%p201_p10)
}
  0x18   :  { %s205_s30 = scalar_lea.vmem %s26_s12, 64  ;;  %p210_p12 = scmp.lt.s32.totalorder %s26_s12, %s26_s12 }
  0x19   :  { %p206_p11 = scmp.ne.s32.totalorder %s26_s12, %s205_s30  ;;  %p211_p13 = scmp.lt.s32.totalorder %s205_s30, %s205_s30 }
  0x1b   :  { %p212_p0 = por %p211_p13, %p210_p12 }
  0x1d   :  { %p213_p1 = pnand %p212_p0, %p206_p11 }
  0x1f   :  { %216 = shalt.err (!%p213_p1)
}
  0x20   :  { %28 = dma.hbm_to_vmem [thread:$0]  %s279_s1, 64, %s26_s12, [#allocation8]  }
  0x21   :  { %217 = dma.done.wait [#allocation6], 64  }
  0x22   :  { %218 = vsyncadd [#allocation6], 4294967232 }
  0x23   :  { %219 = dma.done.wait [#allocation8], 64  }
  0x24   :  { %220 = vsyncadd [#allocation8], 4294967232  ;;  %vm40_vm0 = vcmask 7168   ;;  %v223_v0 = vmov 0.0   ;;  %vm224_vm1 = vmmov 0   ;;  %vm45_vm2 = vcmask 261120  }
  0x25   :  { %42 = vst.msk [vmem:[#allocation3] sm:$0xff] %vm40_vm0, %v223_v0  ;;  %154 = vmatprep.subr.bf16.mxu0 %v223_v0  ;;  %156 = vmatprep.mubr.msk.bf16.mxu0 %vm224_vm1, %v223_v0  ;;  %v44_v1 = vld [vmem:[#allocation7] sm:$0xf]  ;;  %v43_v3 = vld [vmem:[#allocation5] sm:$0xf]  ;;  %v225_v4 = vmov -inf   ;;  %v96_v18 = vlaneseq }
  0x26   :  { %v50_v2 = vsel %vm45_vm2, %v44_v1, 0  ;;  %41 = vst.msk [vmem:[#allocation2] sm:$0xff] %vm40_vm0, %v225_v4  ;;  %vm102_vm3 = vcmask 64512   ;;  %v226_v10 = vmov 0  }
  0x27   :  { %155 = vmatpush3.bf16.xpose.msra.mxu0 %v50_v2  ;;  %166 = vset.pattern.permute.xlu0 %v226_v10  ;;  %v97_v19 = vshrl.u32 %v96_v18, 7  ;;  %v99_v20 = vand.u32 127, %v96_v18 }
  0x29   :  { %vm100_vm4 = vcmp.eq.s32.totalorder %v97_v19, %v99_v20 }
  0x2c   :  { %v128_v27 = vld [vmem:[#allocation3] sm:$0xff] }
  0x2d   :  { %v108_v11 = vld [vmem:[#allocation2] sm:$0xff] }
  0x2e   :  { %157 = vmatmul.mubr.msk.bf16.vlgmr.msra.gmra.mrb[0].mxu0 %vm45_vm2, %v43_v3 }
 0x101   :  { %v86_v5 = vpop.f32.mrb[0].mxu0 }
 0x102   :  { %v158_v6 = vpop.f32.mrb[1].mxu0  ;;  %v110_v7 = vsel %vm102_vm3, %v86_v5, -inf  ;;  %v101_v23 = vsel %vm100_vm4, %v86_v5, 0.0 }
 0x103   :  { %111 = vmax.xlane.f32.xlu0 %v110_v7  ;;  %v89_v8 = vpop.f32.mrb[2].mxu0  ;;  %v103_v24 = vsel %vm102_vm3, %v101_v23, 0.0 }
 0x104   :  { %v159_v9 = vpop.f32.mrb[3].mxu0 }
 0x190   :  { %v112_v12 = vpop.xlane.xlu0 %111 }
 0x191   :  { %v113_v13 = vmax.f32 %v108_v11, %v112_v12 }
 0x193   :  { %v125_v14 = vsub.f32 %v108_v11, %v113_v13  ;;  %133 = vst.msk [vmem:[#allocation2] sm:$0xff] %vm40_vm0, %v113_v13  ;;  %116 = vperm.xlu0 %166, %v113_v13  }
 0x195   :  { %v126_v25 = vmul.f32 1.442695, %v125_v14 }
 0x19a   :  { %v137_v35 = vld [vmem:[#allocation2] sm:$0xff] }
 0x212   :  { %v117_v15 = vpop.permute.xlu0 %116 }
 0x213   :  { %v119_v16 = vsub.f32 %v86_v5, %v117_v15 }
 0x215   :  { %v120_v17 = vmul.f32 1.442695, %v119_v16 }
 0x217   :  { %167 = vpow2.f32 %v120_v17 }
 0x218   :  { %169 = vpow2.f32 %v126_v25 }
 0x221   :  { %v168_v21 = vpop.eup %167 }
 0x222   :  { %v122_v22 = vsel %vm102_vm3, %v168_v21, 0.0  ;;  %v170_v26 = vpop.eup %169 }
 0x223   :  { %123 = vadd.xlane.f32.xlu1 %v122_v22  ;;  %v129_v28 = vmul.f32 %v170_v26, %v128_v27 }
 0x227   :  { %104 = vadd.xlane.f32.xlu1 %v103_v24 }
 0x2b0   :  { %v124_v29 = vpop.xlane.xlu1 %123 }
 0x2b1   :  { %v130_v30 = vadd.f32 %v129_v28, %v124_v29 }
 0x2b3   :  { %132 = vst.msk [vmem:[#allocation3] sm:$0xff] %vm40_vm0, %v130_v30 }
 0x2b4   :  { %v105_v31 = vpop.xlane.xlu1 %104 }
 0x2b5   :  { %107 = vst.msk [vmem:[#allocation4] sm:$0xff] %vm40_vm0, %v105_v31 }
 0x2ba   :  { %v138_v32 = vld [vmem:[#allocation3] sm:$0xff] }
 0x2bb   :  { %171 = vlog2.f32 %v138_v32 }
 0x2bc   :  { %v142_v37 = vld [vmem:[#allocation4] sm:$0xff] }
 0x2c5   :  { %v172_v33 = vpop.eup %171 }
 0x2c6   :  { %v140_v34 = vmul.f32 0.6931472, %v172_v33 }
 0x2c8   :  { %v141_v36 = vadd.f32 %v140_v34, %v137_v35 }
 0x2ca   :  { %v143_v38 = vsub.f32 %v141_v36, %v142_v37 }
 0x2cc   :  { %144 = vst.msk [vmem:[%s280_s2] sm:$0xff] %vm40_vm0, %v143_v38 }
 0x2cd   :  { %149 = vsyncpa [#allocation6], 1 }
 0x2ce   :  { %150 = vsyncpa [#allocation8], 1 }

</bundles_post_ra>
